<compile_context>
chip_gen: v7x
topology: tpu7x:2x2x1
jax: 0.10.0
libtpu: 0.0.40
codegen_flags: <defaults>
</compile_context>

<pallas_src>
import functools

import jax
import jax.numpy as jnp
from jax import lax
from jax.experimental import pallas as pl
from jax.experimental.pallas import tpu as pltpu


# ----------------------------------------------------------------------------
# helpers
# ----------------------------------------------------------------------------

def _round_up(n, m):
    return ((n + m - 1) // m) * m


def _choose_block_rows(M, cap=1024):
    """Row tile: cap rows for long matrices; always >=2 grid steps when M > 8
    so the 'parallel' axis can shard across v7x's two TensorCores."""
    if M <= 8:
        return 8
    return int(min(cap, _round_up(-(-M // 2), 8)))


# ----------------------------------------------------------------------------
# Pallas kernels
# ----------------------------------------------------------------------------

def _matmul_bias_kernel(a_ref, w_ref, b_ref, o_ref, *, activation):
    """o = act(a @ w + bias).  a:(tm,K) bf16  w:(K,N) bf16  b:(1,N) f32."""
    acc = jnp.dot(a_ref[...], w_ref[...], preferred_element_type=jnp.float32)
    acc = acc + b_ref[...]
    if activation == "relu":
        acc = jnp.maximum(acc, 0.0)
    o_ref[...] = acc.astype(o_ref.dtype)


def matmul_bias(a, w, bias, activation="none", out_dtype=jnp.bfloat16):
    """(M,K) bf16 @ (K,N) bf16 + bias, fused activation, ragged M grid."""
    M, K = a.shape
    K2, N = w.shape
    assert K == K2
    M_valid = M
    if M < 8:                       # tiny GEMMs: pad to one sublane group
        a = jnp.pad(a, ((0, 8 - M), (0, 0)))
        M = 8
    tm = _choose_block_rows(M)
    bias2d = bias.reshape(1, N).astype(jnp.float32)
    out = pl.pallas_call(
        functools.partial(_matmul_bias_kernel, activation=activation),
        out_shape=jax.ShapeDtypeStruct((M, N), out_dtype),
        grid=(pl.cdiv(M, tm),),
        in_specs=[
            pl.BlockSpec((tm, K), lambda i: (i, 0)),
            pl.BlockSpec((K, N), lambda i: (0, 0)),
            pl.BlockSpec((1, N), lambda i: (0, 0)),
        ],
        out_specs=pl.BlockSpec((tm, N), lambda i: (i, 0)),
        compiler_params=pltpu.CompilerParams(dimension_semantics=("parallel",)),
    )(a.astype(jnp.bfloat16), w, bias2d)
    return out[:M_valid] if M_valid != M else out


def _fused2_kernel(a_ref, w1_ref, b1_ref, w2_ref, b2_ref, *rest,
                   act1, act2, res_mode):
    """Two chained GEMMs with fused bias/activation and optional residual.

      h   = act1(a @ w1 + b1)                (kept in VMEM/registers)
      acc = h @ w2 + b2
      res_mode == "add_then_relu":  o = relu(acc + res)     (bottleneck tail)
      res_mode == "relu_then_add":  o = relu(acc) + res     (side conv + hyper)
      res_mode == "none":           o = act2(acc)
    The residual is added in f32 before the output downcast.
    """
    if res_mode == "none":
        (o_ref,) = rest
        res_ref = None
    else:
        res_ref, o_ref = rest
    h = jnp.dot(a_ref[...], w1_ref[...], preferred_element_type=jnp.float32)
    h = h + b1_ref[...]
    if act1 == "relu":
        h = jnp.maximum(h, 0.0)
    acc = jnp.dot(h.astype(w2_ref.dtype), w2_ref[...],
                  preferred_element_type=jnp.float32)
    acc = acc + b2_ref[...]
    if res_mode == "add_then_relu":
        acc = jnp.maximum(acc + res_ref[...].astype(jnp.float32), 0.0)
    elif res_mode == "relu_then_add":
        acc = jnp.maximum(acc, 0.0) + res_ref[...].astype(jnp.float32)
    elif act2 == "relu":
        acc = jnp.maximum(acc, 0.0)
    o_ref[...] = acc.astype(o_ref.dtype)


def fused_gemm2(a, w1, b1, w2, b2, residual=None, act1="relu", act2="none",
                res_mode="none", out_dtype=jnp.bfloat16):
    assert (residual is None) == (res_mode == "none")
    M, K1 = a.shape
    N1 = w1.shape[1]
    N2 = w2.shape[1]
    M_valid = M
    if M < 8:
        a = jnp.pad(a, ((0, 8 - M), (0, 0)))
        if residual is not None:
            residual = jnp.pad(residual, ((0, 8 - M), (0, 0)))
        M = 8
    tm = _choose_block_rows(M)
    b1r = b1.reshape(1, N1).astype(jnp.float32)
    b2r = b2.reshape(1, N2).astype(jnp.float32)
    in_specs = [
        pl.BlockSpec((tm, K1), lambda i: (i, 0)),
        pl.BlockSpec((K1, N1), lambda i: (0, 0)),
        pl.BlockSpec((1, N1), lambda i: (0, 0)),
        pl.BlockSpec((N1, N2), lambda i: (0, 0)),
        pl.BlockSpec((1, N2), lambda i: (0, 0)),
    ]
    args = [a.astype(jnp.bfloat16), w1, b1r, w2, b2r]
    if residual is not None:
        in_specs.append(pl.BlockSpec((tm, N2), lambda i: (i, 0)))
        args.append(residual.astype(jnp.bfloat16))
    out = pl.pallas_call(
        functools.partial(_fused2_kernel, act1=act1, act2=act2,
                          res_mode=res_mode),
        out_shape=jax.ShapeDtypeStruct((M, N2), out_dtype),
        grid=(pl.cdiv(M, tm),),
        in_specs=in_specs,
        out_specs=pl.BlockSpec((tm, N2), lambda i: (i, 0)),
        compiler_params=pltpu.CompilerParams(dimension_semantics=("parallel",)),
    )(*args)
    return out[:M_valid] if M_valid != M else out


def _max9_kernel(*refs):
    o_ref = refs[-1]
    m = refs[0][...]
    for r in refs[1:-1]:
        m = jnp.maximum(m, r[...])
    o_ref[...] = m


def maxpool_3x3_s2_p1(x):
    """nn.MaxPool2d(kernel_size=3, stride=2, padding=1), NHWC, lane-dense."""
    B, H, W, C = x.shape
    Ho, Wo = (H - 1) // 2 + 1, (W - 1) // 2 + 1
    xp = jnp.pad(x, ((0, 0), (1, 1), (1, 1), (0, 0)), constant_values=-jnp.inf)
    views = [xp[:, di:di + 2 * Ho - 1:2, dj:dj + 2 * Wo - 1:2, :]
             for di in range(3) for dj in range(3)]
    n = B * Ho * Wo * C
    R = pl.cdiv(n, 128)
    pad = R * 128 - n
    flat = []
    for v in views:
        vf = v.reshape(-1)
        if pad:
            vf = jnp.pad(vf, (0, pad), constant_values=-jnp.inf)
        flat.append(vf.reshape(R, 128))
    tr = min(R, _choose_block_rows(R))
    spec = pl.BlockSpec((tr, 128), lambda i: (i, 0))
    out = pl.pallas_call(
        _max9_kernel,
        out_shape=jax.ShapeDtypeStruct((R, 128), x.dtype),
        grid=(pl.cdiv(R, tr),),
        in_specs=[spec] * 9,
        out_specs=spec,
        compiler_params=pltpu.CompilerParams(dimension_semantics=("parallel",)),
    )(*flat)
    out = out.reshape(-1)
    if pad:
        out = out[:n]
    return out.reshape(B, Ho, Wo, C)


def _mean_kernel(x_ref, o_ref):
    o_ref[...] = jnp.mean(x_ref[...].astype(jnp.float32), axis=1,
                          keepdims=True).astype(o_ref.dtype)


def avgpool7_flatten(x):
    """nn.AvgPool2d(7, stride=1) on a 7x7 map + view(B, -1)."""
    B, H, W, C = x.shape
    assert H == 7 and W == 7, "AvgPool2d(7, stride=1) requires a 7x7 feature map"
    out = pl.pallas_call(
        _mean_kernel,
        out_shape=jax.ShapeDtypeStruct((B, 1, C), x.dtype),
    )(x.reshape(B, H * W, C))
    return out.reshape(B, C)


def _deconv_kernel(a_ref, w_ref, b_ref, o_ref, *, th, W, two_cout):
    """Deconv GEMM with depth-to-space folded into the output block layout.

    a:(th*W, 4*Cin)  w:(4*Cin, 4*cout) columns ordered (r, s, c)
    o block: (th, 2, W, 2*cout) -> final (B, 2H, 2W, cout) is a free reshape.
    """
    acc = jnp.dot(a_ref[...], w_ref[...], preferred_element_type=jnp.float32)
    acc = (acc + b_ref[...]).astype(o_ref.dtype)
    for t in range(th):                       # static unroll; slices are static
        rows = acc[t * W:(t + 1) * W, :]
        o_ref[t, 0, :, :] = rows[:, :two_cout]
        o_ref[t, 1, :, :] = rows[:, two_cout:]


def _deconv_row_tile(BH, W):
    th = min(32, max(8, (2048 // max(W, 1)) // 8 * 8))
    return BH if th >= BH else th


# ----------------------------------------------------------------------------
# JAX glue: patch extraction (bf16) around the Pallas kernels
# ----------------------------------------------------------------------------

def _patches(x, kh, kw, stride, pad):
    # Output feature dim ordered channel-major: (Cin, kh, kw).
    return lax.conv_general_dilated_patches(
        x, (kh, kw), stride, pad,
        dimension_numbers=("NHWC", "HWIO", "NHWC"))


def conv_mm(x, layer, act="none", out_dtype=jnp.bfloat16):
    """Folded conv+BN as one fused Pallas matmul.  1x1 convs skip im2col."""
    kh, kw, stride, pad = layer["kh"], layer["kw"], layer["stride"], layer["pad"]
    if kh == 1 and kw == 1 and pad == 0:
        if stride != 1:
            x = x[:, ::stride, ::stride, :]
        B, Ho, Wo, K = x.shape
        a = x.reshape(B * Ho * Wo, K)
    else:
        p = _patches(x, kh, kw, (stride, stride), ((pad, pad), (pad, pad)))
        B, Ho, Wo, K = p.shape
        a = p.reshape(B * Ho * Wo, K)
    N = layer["wm"].shape[1]
    out = matmul_bias(a, layer["wm"], layer["b"], activation=act,
                      out_dtype=out_dtype)
    return out.reshape(B, Ho, Wo, N)


def conv_transpose_s2(x, layer, out_dtype=jnp.bfloat16):
    """ConvTranspose2d(k=3, s=2, p=1, op=1): 2x2-window matmul to 4*cout phase
    columns; depth-to-space folded into the output BlockSpec (no XLA transpose)."""
    B, H, W, Cin = x.shape
    cout = layer["cout"]
    p = _patches(x, 2, 2, (1, 1), ((0, 1), (0, 1)))          # (B, H, W, 4*Cin)
    a = p.reshape(B * H * W, 4 * Cin).astype(jnp.bfloat16)
    BH = B * H
    th = _deconv_row_tile(BH, W)
    two_cout = 2 * cout
    bias = layer["b"].reshape(1, 4 * cout).astype(jnp.float32)
    out = pl.pallas_call(
        functools.partial(_deconv_kernel, th=th, W=W, two_cout=two_cout),
        out_shape=jax.ShapeDtypeStruct((BH, 2, W, two_cout), out_dtype),
        grid=(pl.cdiv(BH, th),),
        in_specs=[
            pl.BlockSpec((th * W, 4 * Cin), lambda i: (i, 0)),
            pl.BlockSpec((4 * Cin, 4 * cout), lambda i: (0, 0)),
            pl.BlockSpec((1, 4 * cout), lambda i: (0, 0)),
        ],
        out_specs=pl.BlockSpec((th, 2, W, two_cout), lambda i: (i, 0, 0, 0)),
        compiler_params=pltpu.CompilerParams(dimension_semantics=("parallel",)),
    )(a, layer["wm"], bias)
    # (BH, 2, W, 2*cout) == (B, 2H, 2W, cout) in row-major order: free reshape.
    return out.reshape(B, 2 * H, 2 * W, cout)


def bottleneck(x, p):
    """conv1 (1x1) as one GEMM; conv2(3x3)+conv3(1x1)+identity+ReLU fused."""
    y = conv_mm(x, p["conv1"], act="relu")
    identity = conv_mm(x, p["down"], act="none") if "down" in p else x
    l2 = p["conv2"]
    s = l2["stride"]
    pats = _patches(y, 3, 3, (s, s), ((1, 1), (1, 1)))
    B, Ho, Wo, K = pats.shape
    cout = p["conv3"]["wm"].shape[1]
    out = fused_gemm2(pats.reshape(B * Ho * Wo, K), l2["wm"], l2["b"],
                      p["conv3"]["wm"], p["conv3"]["b"],
                      residual=identity.reshape(B * Ho * Wo, cout),
                      act1="relu", res_mode="add_then_relu")
    return out.reshape(B, Ho, Wo, cout)


def side_block(x, p, residual=None):
    """side_conv: conv(3x3,s2)+BN+ReLU -> conv(1x1)+BN+ReLU, fused; the hyper
    residual (added after the final ReLU in the reference) is fused in f32."""
    pats = _patches(x, 3, 3, (2, 2), ((1, 1), (1, 1)))
    B, Ho, Wo, K = pats.shape
    cout = p["conv2"]["wm"].shape[1]
    res_flat = (residual.reshape(B * Ho * Wo, cout)
                if residual is not None else None)
    out = fused_gemm2(pats.reshape(B * Ho * Wo, K), p["conv1"]["wm"],
                      p["conv1"]["b"], p["conv2"]["wm"], p["conv2"]["b"],
                      residual=res_flat, act1="relu", act2="relu",
                      res_mode="relu_then_add" if residual is not None else "none")
    return out.reshape(B, Ho, Wo, cout)


def forward(prep, x_nchw):
    x = jnp.transpose(x_nchw, (0, 2, 3, 1)).astype(jnp.bfloat16)  # NCHW -> NHWC

    x = conv_mm(x, prep["conv1"], act="relu")
    x = maxpool_3x3_s2_p1(x)

    for blk in prep["layer1"]:
        x = bottleneck(x, blk)
    res2c = x
    for blk in prep["layer2"]:
        x = bottleneck(x, blk)
    res3b3 = x
    for blk in prep["layer3"]:
        x = bottleneck(x, blk)
    res4b22 = x
    for blk in prep["layer4"]:
        x = bottleneck(x, blk)
    res5c = x

    # hyper path: each side block fuses the following "+ res" (after its ReLU).
    hyper = side_block(res2c, prep["side1"], residual=res3b3)
    hyper = side_block(hyper, prep["side2"], residual=res4b22)
    hyper = side_block(hyper, prep["side3"], residual=res5c)

    feat = avgpool7_flatten(hyper)           # (B, nr_of_features) bf16

    # all three task branches in one fused 2-layer GEMM (block-diagonal W2).
    br = prep["branches"]
    head = fused_gemm2(feat, br["w1"], br["b1"], br["w2"], br["b2"],
                       act1="relu", act2="none", out_dtype=jnp.float32)
    n_lm, n_bb = br["n_lm"], br["n_bbox"]
    pred_lm = head[:, :n_lm]
    pred_bbox = head[:, n_lm:n_lm + n_bb]
    pred_attr = jax.nn.sigmoid(head[:, n_lm + n_bb:])

    seg = hyper
    for name in ("up1", "up2", "up3", "up4"):
        seg = conv_transpose_s2(seg, prep[name], out_dtype=jnp.bfloat16)
    seg = conv_transpose_s2(seg, prep["up5"], out_dtype=jnp.float32)
    pred_seg = jnp.transpose(seg, (0, 3, 1, 2))               # back to NCHW

    return pred_lm, pred_bbox, pred_attr, pred_seg


# ----------------------------------------------------------------------------
# One-time parameter preparation (BN fold, bf16 matrices, merged weights)
# ----------------------------------------------------------------------------

def fold_conv_bn(conv, bn, kh, kw, stride, pad):
    w = conv["w"]                                # (cin, kh, kw, cout)
    cin, _, _, cout = w.shape
    if bn is not None:
        scale = bn["gamma"] / jnp.sqrt(bn["var"] + 1e-5)
        bias = bn["beta"] - bn["mean"] * scale
        if conv.get("b") is not None:
            bias = bias + conv["b"] * scale
        w = w * scale
    else:
        bias = conv["b"] if conv.get("b") is not None else jnp.zeros((cout,), jnp.float32)
    return {"wm": w.reshape(cin * kh * kw, cout).astype(jnp.bfloat16),
            "b": bias.astype(jnp.float32),
            "kh": kh, "kw": kw, "stride": stride, "pad": pad}


def prep_bottleneck(p):
    q = {"conv1": fold_conv_bn(p["conv1"], p["bn1"], 1, 1, 1, 0),
         "conv2": fold_conv_bn(p["conv2"], p["bn2"], 3, 3, p["stride"], 1),
         "conv3": fold_conv_bn(p["conv3"], p["bn3"], 1, 1, 1, 0)}
    if "down_conv" in p:
        q["down"] = fold_conv_bn(p["down_conv"], p["down_bn"], 1, 1, p["stride"], 0)
    return q


def make_deconv_matrix(wt):
    """wt: (cin,3,3,cout) ConvTranspose weight -> (4*cin, 4*cout) phase matrix.
    Patch feature order (ci, pi, pj); output column order (r, s, co)."""
    cin, _, _, cout = wt.shape
    Wm = jnp.zeros((cin, 2, 2, 2, 2, cout), jnp.float32)
    Wm = Wm.at[:, 0, 0, 0, 0, :].set(wt[:, 1, 1, :])   # even row, even col
    Wm = Wm.at[:, 0, 0, 0, 1, :].set(wt[:, 1, 2, :])   # even row, odd col
    Wm = Wm.at[:, 0, 1, 0, 1, :].set(wt[:, 1, 0, :])
    Wm = Wm.at[:, 0, 0, 1, 0, :].set(wt[:, 2, 1, :])   # odd row, even col
    Wm = Wm.at[:, 1, 0, 1, 0, :].set(wt[:, 0, 1, :])
    Wm = Wm.at[:, 0, 0, 1, 1, :].set(wt[:, 2, 2, :])   # odd row, odd col
    Wm = Wm.at[:, 0, 1, 1, 1, :].set(wt[:, 2, 0, :])
    Wm = Wm.at[:, 1, 0, 1, 1, :].set(wt[:, 0, 2, :])
    Wm = Wm.at[:, 1, 1, 1, 1, :].set(wt[:, 0, 0, :])
    return Wm.reshape(cin * 4, 4 * cout)


def prep_deconv(conv):
    wt = conv["w"]
    cin, _, _, cout = wt.shape
    return {"wm": make_deconv_matrix(wt).astype(jnp.bfloat16),
            "b": jnp.tile(conv["b"].astype(jnp.float32), 4),
            "cout": cout}


def prep_branches(P):
    Hd = P["branch_lm"]["w1"].shape[1]
    w1 = jnp.concatenate([P["branch_lm"]["w1"], P["branch_bbox"]["w1"],
                          P["branch_attr"]["w1"]], axis=1).astype(jnp.bfloat16)
    b1 = jnp.concatenate([P["branch_lm"]["b1"], P["branch_bbox"]["b1"],
                          P["branch_attr"]["b1"]]).astype(jnp.float32)
    n_lm = P["branch_lm"]["w2"].shape[1]
    n_bb = P["branch_bbox"]["w2"].shape[1]
    n_at = P["branch_attr"]["w2"].shape[1]
    total = n_lm + n_bb + n_at
    w2 = jnp.zeros((3 * Hd, total), jnp.float32)
    w2 = w2.at[0:Hd, 0:n_lm].set(P["branch_lm"]["w2"])
    w2 = w2.at[Hd:2 * Hd, n_lm:n_lm + n_bb].set(P["branch_bbox"]["w2"])
    w2 = w2.at[2 * Hd:, n_lm + n_bb:].set(P["branch_attr"]["w2"])
    b2 = jnp.concatenate([P["branch_lm"]["b2"], P["branch_bbox"]["b2"],
                          P["branch_attr"]["b2"]]).astype(jnp.float32)
    return {"w1": w1, "b1": b1, "w2": w2.astype(jnp.bfloat16), "b2": b2,
            "n_lm": n_lm, "n_bbox": n_bb, "n_attr": n_at}


def prepare_params(P):
    Q = {"conv1": fold_conv_bn(P["conv1"], P["bn1"], 7, 7, 2, 3)}
    for li in range(1, 5):
        Q[f"layer{li}"] = [prep_bottleneck(b) for b in P[f"layer{li}"]]
    for si in range(1, 4):
        sp = P[f"side{si}"]
        Q[f"side{si}"] = {"conv1": fold_conv_bn(sp["conv1"], sp["bn1"], 3, 3, 2, 1),
                          "conv2": fold_conv_bn(sp["conv2"], sp["bn2"], 1, 1, 1, 0)}
    Q["branches"] = prep_branches(P)
    for ui in range(1, 6):
        Q[f"up{ui}"] = prep_deconv(P[f"up{ui}"])
    return Q


# ----------------------------------------------------------------------------
# Deterministic synthetic parameters
# ----------------------------------------------------------------------------

class ParamGen:
    def __init__(self, seed):
        self._key = jax.random.PRNGKey(seed)
        self._n = 0

    def normal(self, shape, std=1.0):
        k = jax.random.fold_in(self._key, self._n)
        self._n += 1
        return std * jax.random.normal(k, shape, dtype=jnp.float32)


def make_conv(pg, cin, kh, kw, cout, bias=False):
    std = (2.0 / (cin * kh * kw)) ** 0.5
    p = {"w": pg.normal((cin, kh, kw, cout), std)}
    p["b"] = pg.normal((cout,), 0.01) if bias else None
    return p


def make_bn(pg, c):
    return {"gamma": 1.0 + pg.normal((c,), 0.1),
            "beta": pg.normal((c,), 0.1),
            "mean": pg.normal((c,), 0.1),
            "var": 1.0 + 0.1 * jnp.abs(pg.normal((c,), 1.0))}


def make_bottleneck(pg, cin, width, cout, stride):
    p = {"conv1": make_conv(pg, cin, 1, 1, width),
         "bn1": make_bn(pg, width),
         "conv2": make_conv(pg, width, 3, 3, width),
         "bn2": make_bn(pg, width),
         "conv3": make_conv(pg, width, 1, 1, cout),
         "bn3": make_bn(pg, cout),
         "stride": stride}
    if stride != 1 or cin != cout:
        p["down_conv"] = make_conv(pg, cin, 1, 1, cout)
        p["down_bn"] = make_bn(pg, cout)
    return p


def make_side(pg, c, cout):
    return {"conv1": make_conv(pg, c, 3, 3, c, bias=True), "bn1": make_bn(pg, c),
            "conv2": make_conv(pg, c, 1, 1, cout, bias=True), "bn2": make_bn(pg, cout)}


def make_mlp(pg, nin, nh, nout):
    return {"w1": pg.normal((nin, nh), (2.0 / nin) ** 0.5),
            "b1": pg.normal((nh,), 0.01),
            "w2": pg.normal((nh, nout), (1.0 / nh) ** 0.5),
            "b2": pg.normal((nout,), 0.01)}


def build_params(seed=0, n_attributes=8, nr_of_landmarks=5):
    BASE = 8          # 64 / 8  (width-scaled resnet)
    UP = 8            # 64 / 8  (deconv channels)
    HIDDEN = 64       # 512 / 8
    pg = ParamGen(seed)
    P = {"conv1": make_conv(pg, 3, 7, 7, BASE), "bn1": make_bn(pg, BASE)}

    stage_cfg = [  # (num_blocks, width, out_channels, first_stride)
        (2, BASE, BASE * 4, 1),
        (2, BASE * 2, BASE * 8, 2),
        (2, BASE * 4, BASE * 16, 2),
        (2, BASE * 8, BASE * 32, 2),
    ]
    cin = BASE
    for li, (nb, width, cout, stride) in enumerate(stage_cfg, start=1):
        blocks = []
        for b in range(nb):
            blocks.append(make_bottleneck(pg, cin, width, cout, stride if b == 0 else 1))
            cin = cout
        P[f"layer{li}"] = blocks

    P["side1"] = make_side(pg, BASE * 4, BASE * 8)
    P["side2"] = make_side(pg, BASE * 8, BASE * 16)
    P["side3"] = make_side(pg, BASE * 16, BASE * 32)

    feat = BASE * 32
    P["branch_lm"] = make_mlp(pg, feat, HIDDEN, nr_of_landmarks * 2)
    P["branch_bbox"] = make_mlp(pg, feat, HIDDEN, 4)
    P["branch_attr"] = make_mlp(pg, feat, HIDDEN, n_attributes)

    # ConvTranspose weights stored as (cin, kh, kw, cout).
    P["up1"] = make_conv(pg, feat, 3, 3, UP, bias=True)
    P["up2"] = make_conv(pg, UP, 3, 3, UP, bias=True)
    P["up3"] = make_conv(pg, UP, 3, 3, UP, bias=True)
    P["up4"] = make_conv(pg, UP, 3, 3, UP, bias=True)
    P["up5"] = make_conv(pg, UP, 3, 3, 1, bias=True)
    return P


# ----------------------------------------------------------------------------
# Numerical self-checks (im2col ordering + deconv phase matrix vs lax)
# ----------------------------------------------------------------------------

def _numerics_selfcheck():
    key = jax.random.PRNGKey(123)
    x = jax.random.normal(key, (1, 12, 12, 8), jnp.float32)
    x = x.astype(jnp.bfloat16).astype(jnp.float32)        # bf16-representable

    # 3x3 stride-2 pad-1 conv (the bottleneck/side im2col path), no BN.
    w = (0.2 * jax.random.normal(jax.random.fold_in(key, 1), (8, 3, 3, 16),
                                 jnp.float32)).astype(jnp.bfloat16).astype(jnp.float32)
    b = 0.1 * jax.random.normal(jax.random.fold_in(key, 2), (16,), jnp.float32)
    layer = fold_conv_bn({"w": w, "b": b}, None, 3, 3, 2, 1)
    got = conv_mm(x.astype(jnp.bfloat16), layer, act="none", out_dtype=jnp.float32)
    ref = lax.conv_general_dilated(
        x, jnp.transpose(w, (1, 2, 0, 3)), (2, 2), ((1, 1), (1, 1)),
        dimension_numbers=("NHWC", "HWIO", "NHWC")) + b
    err = float(jnp.max(jnp.abs(got - ref)))
    assert err < 2e-2, f"conv self-check failed, max abs err {err}"

    # ConvTranspose2d(k=3, s=2, p=1, output_padding=1) == lhs-dilated conv with
    # flipped kernel and padding ((1,2),(1,2)).
    wt = (0.2 * jax.random.normal(jax.random.fold_in(key, 3), (8, 3, 3, 4),
                                  jnp.float32)).astype(jnp.bfloat16).astype(jnp.float32)
    bt = 0.1 * jax.random.normal(jax.random.fold_in(key, 4), (4,), jnp.float32)
    dlayer = prep_deconv({"w": wt, "b": bt})
    got_t = conv_transpose_s2(x.astype(jnp.bfloat16), dlayer, out_dtype=jnp.float32)
    ref_t = lax.conv_general_dilated(
        x, jnp.transpose(wt[:, ::-1, ::-1, :], (1, 2, 0, 3)), (1, 1),
        ((1, 2), (1, 2)), lhs_dilation=(2, 2),
        dimension_numbers=("NHWC", "HWIO", "NHWC")) + bt
    err_t = float(jnp.max(jnp.abs(got_t - ref_t)))
    assert err_t < 2e-2, f"conv-transpose self-check failed, max abs err {err_t}"


# ----------------------------------------------------------------------------
# Main
# ----------------------------------------------------------------------------

if __name__ == "__main__":
    _numerics_selfcheck()

    n_attributes = 8
    nr_of_landmarks = 5
    raw = build_params(seed=0, n_attributes=n_attributes,
                       nr_of_landmarks=nr_of_landmarks)
    prep = prepare_params(raw)   # one-time: BN fold, bf16 matrices, merges

    # Input must be 224x224 so the final feature map is 7x7 (AvgPool2d(7, 1)).
    x = jax.random.normal(jax.random.PRNGKey(0), (2, 3, 224, 224), dtype=jnp.float32)

    fwd = jax.jit(lambda inp: forward(prep, inp))
    pred_lm, pred_bbox, pred_attr, pred_seg = fwd(x)
    jax.block_until_ready((pred_lm, pred_bbox, pred_attr, pred_seg))

    assert pred_lm.shape == (2, nr_of_landmarks * 2)
    assert pred_bbox.shape == (2, 4)
    assert pred_attr.shape == (2, n_attributes)
    assert pred_seg.shape == (2, 1, 224, 224)
    assert bool(jnp.all(jnp.isfinite(pred_lm)))
    assert bool(jnp.all(jnp.isfinite(pred_seg)))
    assert bool(jnp.all((pred_attr >= 0.0) & (pred_attr <= 1.0)))

    print("KERNEL_OK")
</pallas_src>

<mosaic_0001>
module attributes {stable_mosaic.version = 11 : i64} {
  func.func @_matmul_bias_kernel(%arg0: i32, %arg1: memref<24x72xbf16, #tpu.memory_space<vmem>>, %arg2: memref<72x16xbf16, #tpu.memory_space<vmem>>, %arg3: memref<1x16xf32, #tpu.memory_space<vmem>>, %arg4: memref<24x16xf32, #tpu.memory_space<vmem>>) attributes {dimension_semantics = [#tpu.dimension_semantics<parallel>], iteration_bounds = array<i64: 2>, scalar_prefetch = 0 : i64, scratch_operands = 0 : i64, tpu.core_type = #tpu.core_type<tc>, window_params = [{transform_indices = @transform_0, window_bounds = array<i64: 24, 72>}, {pipeline_mode = #tpu.pipeline_mode<synchronous>, transform_indices = @transform_1, window_bounds = array<i64: 72, 16>}, {pipeline_mode = #tpu.pipeline_mode<synchronous>, transform_indices = @transform_2, window_bounds = array<i64: 1, 16>}, {transform_indices = @transform_3, window_bounds = array<i64: 24, 16>}]} {
    %c0 = arith.constant 0 : index
    %c0_0 = arith.constant 0 : index
    %0 = vector.load %arg1[%c0, %c0_0] : memref<24x72xbf16, #tpu.memory_space<vmem>>, vector<24x72xbf16>
    %c0_1 = arith.constant 0 : index
    %c0_2 = arith.constant 0 : index
    %1 = vector.load %arg2[%c0_1, %c0_2] : memref<72x16xbf16, #tpu.memory_space<vmem>>, vector<72x16xbf16>
    %cst = arith.constant dense<0.000000e+00> : vector<24x16xf32>
    %2 = tpu.matmul %0, %1, %cst {dimension_numbers = #tpu.dot_dimension_numbers<[1], [0], [0], [1], [0, 0, 1, 1], [], []>} : vector<24x72xbf16>, vector<72x16xbf16>, vector<24x16xf32> -> vector<24x16xf32>
    %c0_3 = arith.constant 0 : index
    %c0_4 = arith.constant 0 : index
    %3 = vector.load %arg3[%c0_3, %c0_4] : memref<1x16xf32, #tpu.memory_space<vmem>>, vector<1x16xf32>
    %4 = vector.broadcast %3 : vector<1x16xf32> to vector<24x16xf32>
    %5 = arith.addf %2, %4 : vector<24x16xf32>
    %c0_5 = arith.constant 0 : index
    %c0_6 = arith.constant 0 : index
    %6 = vector.load %arg4[%c0_5, %c0_6] : memref<24x16xf32, #tpu.memory_space<vmem>>, vector<24x16xf32>
    tpu.vector_store %arg4[%c0_5, %c0_6], %5 {strides = array<i32>} : memref<24x16xf32, #tpu.memory_space<vmem>>, vector<24x16xf32>,
    return
  }
  func.func @transform_0(%arg0: i32) -> (i32, i32) {
    %c0_i32 = arith.constant 0 : i32
    %c0_i32_0 = arith.constant 0 : i32
    return %arg0, %c0_i32 : i32, i32
  }
  func.func @transform_1(%arg0: i32) -> (i32, i32) {
    %c0_i32 = arith.constant 0 : i32
    %c0_i32_0 = arith.constant 0 : i32
    %c0_i32_1 = arith.constant 0 : i32
    return %c0_i32, %c0_i32_0 : i32, i32
  }
  func.func @transform_2(%arg0: i32) -> (i32, i32) {
    %c0_i32 = arith.constant 0 : i32
    %c0_i32_0 = arith.constant 0 : i32
    %c0_i32_1 = arith.constant 0 : i32
    return %c0_i32, %c0_i32_0 : i32, i32
  }
  func.func @transform_3(%arg0: i32) -> (i32, i32) {
    %c0_i32 = arith.constant 0 : i32
    %c0_i32_0 = arith.constant 0 : i32
    return %arg0, %c0_i32 : i32, i32
  }
}

</mosaic_0001>

<bundles_post_ra>
// kernel: tpu_custom_call.1
= control target key start
LH: loop header
LB: loop body
LE: loop exit
PB: predicated region body
PF: predicated region fallthrough
CT: control target
= control target key end

     0   :  { %s794_s12 = smov 0   ;;  %s796_s13 = smov 0   ;;  %s891_s0 = inlined_call_operand.vmem [shape: bf16[36,72], index: 0, kind: input, shape index: {}]   ;;  %s892_s1 = inlined_call_operand.vmem [shape: bf16[72,16], index: 1, kind: input, shape index: {}]   ;;  %s893_s2 = inlined_call_operand.vmem [shape: f32[1,16], index: 2, kind: input, shape index: {}]   ;;  %s894_s3 = inlined_call_operand.vmem [shape: f32[36,16], index: 3, kind: output, shape index: {}]  }
   0x1   :  { %s798_s14 = smov 0  }
   0x2 LB: > { %s807_s15 = sadd.s32 4294967295, %s740_s14   ;;  %s809_s16 = sadd.s32 1, %s740_s14   ;;  %s740_s14 = sphi %s798_s14, %s898_s14   ;;  %s736_s13 = sphi %s796_s13, %s897_s13   ;;  %s732_s12 = sphi %s794_s12, %s896_s12  }
   0x3   : > { %s85_s17 = ssub.s32 %s740_s14, %s809_s16  ;;  %s88_s18 = sadd.s32 1, %s736_s13 }
   0x4   : > { %p86_p0 = scmp.eq.s32.totalorder %s85_s17, 0  ;;  %p98_p1 = scmp.ne.s32.totalorder %s736_s13, %s732_s12 }
   0x5   : > { %p99_p2 = scmp.eq.s32.totalorder %s807_s15, 1  ;;  %p538_p3 = scmp.ge.s32.totalorder %s740_s14, 1 }
   0x6   : > { %s817_s19 = scalar_select %p86_p0, %s736_s13, %s88_s18  }
   0x7   : > { %p819_p4 = por %p99_p2, %p98_p1  ;;  %p146_p5 = scmp.lt.s32.totalorder %s740_s14, 3 }
   0x9   : > { %p147_p6 = pnand %p538_p3, %p146_p5 }
   0xa   : > { %v675_v0 = vld [vmem:[%s892_s1] sm:$0xff] (!%p147_p6)   ;;  %v676_v1 = vld [vmem:[%s892_s1 + $0x8] sm:$0xff] (!%p147_p6)   ;;  %s830_s25 = smul.u32 (!%p147_p6), 3, %s807_s15  ;;  %v677_v2 = vld [vmem:[%s892_s1 + $0x10] sm:$0xff] (!%p147_p6)   ;;  %vm247_vm0 = vcmask (!%p147_p6), 588800   ;;  %vm254_vm1 = vcmask (!%p147_p6), 1043456  }
   0xb   : > { %150 = sbr.rel (%p147_p6) target bundleno = 310 (0x136), region = 32  ;;  %570 = vmatprep.subr.bf16.mxu0 (!%p147_p6), %v675_v0  ;;  %v678_v3 = vld [vmem:[%s892_s1 + $0x18] sm:$0xff] (!%p147_p6)   ;;  %v679_v5 = vld [vmem:[%s892_s1 + $0x20] ss:$0 sps:$4 sm:$0xff] (!%p147_p6)   ;;  %s170_s10 = sand.u32 (!%p147_p6), 1, %s732_s12   ;;  %vm306_vm2 = vcmask (!%p147_p6), 130048  }
   0xc   : > { %571 = vmatpush3.bf16.msra.mxu0 (!%p147_p6), %v675_v0  ;;  %p178_p7 = scmp.lt.s32.totalorder (!%p147_p6), %s830_s25, 4  ;;  %v256_v6 = vsel (!%p147_p6), %vm254_vm1, %v679_v5, 0  ;;  %s585_s11 = smul.u32 (!%p147_p6), 24, %s170_s10  ;;  %v540_v8 = vld [vmem:[%s893_s2] ss:$0 sm:$0xff] (!%p147_p6) }
   0xd   : > { %572 = vmatprep.subr.bf16.mxu0 (!%p147_p6), %v676_v1 }
   0xe   : > { %s850_s18 = scalar_lea.vmem (!%p147_p6), [#allocation2], %s585_s11  }
  0x10   : > { %573 = vmatpush3.bf16.msra.mxu0 (!%p147_p6), %v676_v1 }
  0x11   : > { %574 = vmatprep.subr.bf16.mxu0 (!%p147_p6), %v677_v2 }
  0x12   : > { %s179_s28 = scalar_select %p178_p7, %s830_s25, 4 }
  0x13   : > { %s318_s12 = ssub.s32 (%p819_p4), 5, %s830_s25  ;;  %s562_s21 = smul.u32 (%p819_p4), 24, %s807_s15 }
  0x14   : > { %s539_s29 = sshll.u32 %s179_s28, 2  ;;  %575 = vmatpush3.bf16.msra.mxu0 %v677_v2  ;;  %p319_p8 = scmp.lt.s32.totalorder (%p819_p4), %s318_s12, 3 }
  0x15   : > { %s181_s7 = scalar_lea.vmem %s891_s0, %s539_s29  ;;  %576 = vmatprep.subr.bf16.mxu0 %v678_v3  ;;  %s862_s24 = scalar_lea.vmem (%p819_p4), %s894_s3, %s562_s21  }
  0x16   : > { %v680_v4 = vld [vmem:[%s181_s7] sm:$0xff]   ;;  %v681_v7 = vld [vmem:[%s181_s7 + $0x8] ss:$0 sps:$4 sm:$0xff]  }
  0x17   : > { %580 = vmatprep.mubr.msk.bf16.mxu0 %vm247_vm0, %v680_v4 }
  0x18   : > { %577 = vmatpush3.bf16.msra.mxu0 %v678_v3 }
  0x19   : > { %584 = vmatprep.subr.msk.bf16.mxu0 %vm254_vm1, %v679_v5 }
  0x1c   : > { %579 = vmatpush3.bf16.msra.mxu0 %v256_v6 }
  0x1f   : > { %581 = vmatmul.mubr.msk.bf16.vlgmr.msra.gmra.mrb[0].mxu0 %vm247_vm0, %v681_v7 }
  0xf2   : > { %v582_v9 = vpop.f32.mrb[0].mxu0  ;;  %316 = sbr.rel (!%p819_p4) target bundleno = 310 (0x136), region = 36 }
  0xf3   : > { %v301_v10 = vadd.f32 %v582_v9, %v540_v8  ;;  %v292_v11 = vpop.f32.mrb[1].mxu0 }
  0xf4   : > { %v293_v12 = vadd.f32 %v540_v8, %v292_v11  ;;  %v583_v13 = vpop.f32.mrb[2].mxu0 }
  0xf5   : > { %309 = vst.msk [vmem:[%s850_s18 + $0x10] sm:$0xff] %vm306_vm2, %v301_v10  ;;  %v295_v14 = vpop.f32.mrb[3].mxu0 }
  0xf6   : > { %307 = vst.msk [vmem:[%s850_s18] sm:$0xff] %vm306_vm2, %v293_v12  ;;  %v296_v15 = vadd.f32 %v540_v8, %v295_v14 }
  0xf8   : > { %308 = vst.msk [vmem:[%s850_s18 + $0x8] sm:$0xff] %vm306_vm2, %v296_v15 }
  0xf9   : > { %s900_s12 = smov (!%p319_p8, %s318_s12), 3 }
  0xfa   : > { %s550_s26 = sshll.u32 %s900_s12, 7 }
  0xfb   : > { %p553_p9 = scmp.eq.s32.totalorder %s550_s26, 0 }
  0xfc   : > { %682 = sdivrem.u32 (!%p553_p9), %s900_s12, 3 }
  0xfd   : > { %327 = sbr.rel (%p553_p9) target bundleno = 310 (0x136), region = 40 }
 0x105   : > { %s868_s20 = spop.drf %682 }
 0x106   : > { %p554_p10 = scmp.le.s32.totalorder %s868_s20, 0 }
 0x107   : > { %s742_s15 = smov (!%p554_p10), %s862_s24   ;;  %s746_s25 = smov (!%p554_p10), %s850_s18  }
 0x108   : > { %491 = sbr.rel (%p554_p10) target bundleno = 281 (0x119), region = 116  ;;  %s750_s27 = smov (!%p554_p10), 0  }
 0x109   : > { %s754_s28 = smov (!%p554_p10), 0  }
 0x10f LB: >> { %v395_v16 = vld [vmem:[%s748_s25] sm:$0xff]  ;;  %v397_v17 = vld [vmem:[%s748_s25 + $0x8] sm:$0xff]  ;;  %v399_v18 = vld [vmem:[%s748_s25 + $0x10] sm:$0xff]  ;;  %s401_s29 = sadd.s32 1, %s752_s27  ;;  %s389_s28 = sadd.s32 1, %s756_s28   ;;  %s756_s28 = sphi %s754_s28, %s389_s28   ;;  %s752_s27 = sphi %s750_s27, %s751_s27   ;;  %s748_s25 = sphi %s746_s25, %s406_s25   ;;  %s744_s15 = sphi %s742_s15, %s407_s15  }
 0x110   : >> { %396 = vst [vmem:[%s744_s15] sm:$0xff] %v395_v16  ;;  %398 = vst [vmem:[%s744_s15 + $0x8] sm:$0xff] %v397_v17  ;;  %p402_p11 = scmp.ge.s32.totalorder %s401_s29, %s868_s20  ;;  %p388_p12 = scmp.ge.s32.totalorder %s389_s28, %s868_s20 }
 0x111   : >> { %400 = vst [vmem:[%s744_s15 + $0x10] sm:$0xff] %v399_v18 }
 0x112   : >> { %s902_s29 = smov (%p402_p11, %s401_s29), 0  ;;  %391 = sbr.rel (!%p388_p12) target bundleno = 271 (0x10f), region = 122 }
 0x113   : >> { %s404_s30 = smul.u32 24, %s902_s29  ;;  %s751_s27 = smov %s902_s29  }
 0x115   : >> { %s406_s25 = scalar_lea.vmem %s850_s18, %s404_s30 [#allocation2]   ;;  %s407_s15 = scalar_lea.vmem %s862_s24, %s404_s30  }
 0x119 PF: > { %684 = sdivrem.u32 %s900_s12, 3 }
 0x11a   : > { %s555_s4 = smul.u32 24, %s868_s20 }
 0x11c   : > { %s412_s5 = scalar_lea.vmem %s850_s18, %s555_s4 [#allocation2]   ;;  %s414_s6 = scalar_lea.vmem %s862_s24, %s555_s4  }
 0x122   : > { %s685_s7 = spop.drf %684 }
 0x123   : > { %p557_p13 = scmp.le.s32.totalorder %s685_s7, 0 }
 0x124   : > { %s758_s8 = smov (!%p557_p13), %s414_s6   ;;  %s762_s9 = smov (!%p557_p13), %s412_s5  }
 0x125   : > { %505 = sbr.rel (%p557_p13) target bundleno = 310 (0x136), region = 127  ;;  %s766_s10 = smov (!%p557_p13), 0  }
 0x126   : > { %s770_s11 = smov (!%p557_p13), 0  }
 0x12c LB: >> { %v424_v19 = vld [vmem:[%s764_s9] sm:$0xff]  ;;  %s426_s14 = sadd.s32 1, %s768_s10  ;;  %s418_s11 = sadd.s32 1, %s772_s11   ;;  %s772_s11 = sphi %s770_s11, %s418_s11   ;;  %s768_s10 = sphi %s766_s10, %s767_s10   ;;  %s764_s9 = sphi %s762_s9, %s431_s9   ;;  %s760_s8 = sphi %s758_s8, %s432_s8  }
 0x12d   : >> { %425 = vst [vmem:[%s760_s8] sm:$0xff] %v424_v19  ;;  %p427_p0 = scmp.ge.s32.totalorder %s426_s14, %s685_s7  ;;  %p417_p1 = scmp.ge.s32.totalorder %s418_s11, %s685_s7 }
 0x12f   : >> { %s904_s14 = smov (%p427_p0, %s426_s14), 0  ;;  %420 = sbr.rel (!%p417_p1) target bundleno = 300 (0x12c), region = 133 }
 0x130   : >> { %s558_s17 = sshll.u32 %s904_s14, 3  ;;  %s767_s10 = smov %s904_s14  }
 0x131   : >> { %s431_s9 = scalar_lea.vmem %s412_s5, %s558_s17 [#allocation2]   ;;  %s432_s8 = scalar_lea.vmem %s414_s6, %s558_s17  }
 0x136 PF: > { %p10_p2 = scmp.ge.s32.totalorder %s809_s16, 4   ;;  %s896_s12 = smov %s736_s13 }
 0x137   : > { %s897_s13 = smov %s817_s19  ;;  %s898_s14 = smov %s809_s16 }
 0x138   :  { %12 = sbr.rel (!%p10_p2) target bundleno = 2 (0x2), region = 144 }

</bundles_post_ra>
